<compile_context>
chip_gen: v6e
topology: v6e:2x2x1
jax: 0.10.0
libtpu: 0.0.40
codegen_flags: <defaults>
</compile_context>

<pallas_src>
import functools

import jax
import jax.numpy as jnp
from jax.experimental import pallas as pl
from jax.experimental.pallas import tpu as pltpu


_TARGET_BLOCK_BYTES = 2 * 1024 * 1024   # ~2 MiB of input per grid step
_VMEM_LIMIT_BYTES = 32 * 1024 * 1024    # fits v7x (64 MiB phys), raises v5e default


def _squash_kernel(x_ref, o_ref, *, eps):
    # x_ref: (Bb, C, T) block in VMEM; reduce over the channel (sublane) axis.
    x = x_ref[...].astype(jnp.float32)
    n2 = jnp.sum(x * x, axis=1, keepdims=True)            # (Bb, 1, T)
    n = jnp.sqrt(n2)                                      # ||x|| over channels
    # scale = n^2 / (1+n^2) / (n+eps)  ->  one reciprocal instead of two divides
    # (approx=False keeps f32 outputs within 1e-5 of the reference).
    scale = n2 * pl.reciprocal((1.0 + n2) * (n + eps), approx=False)
    o_ref[...] = (scale * x).astype(o_ref.dtype)


def _largest_divisor_leq(n, cap):
    """Largest divisor of n that is <= cap (always >= 1)."""
    cap = max(1, min(n, cap))
    best = 1
    k = 1
    while k * k <= n:
        if n % k == 0:
            for d in (k, n // k):
                if d <= cap and d > best:
                    best = d
        k += 1
    return best


def _choose_blocking(B, C, HW, itemsize, target_bytes=_TARGET_BLOCK_BYTES):
    """Pick (batch_block, lane_tile, num_lane_tiles) for the (B, C, HW) layout."""
    lane_aligned = (HW % 128 == 0)
    if lane_aligned:
        # Largest 128-multiple divisor of HW whose (C, t) slab stays <= target.
        cap_lanes = max(128, target_bytes // max(C * itemsize, 1))
        t = 128 * _largest_divisor_leq(HW // 128, cap_lanes // 128)
    else:
        # Non-128-multiple lane axis: block must span the full axis; ragged-edge
        # stores are masked.
        # TODO(synk): repack to a lane-dense (C, B*H*W) layout (needs a transpose
        # pass) when B*H*W is 128-aligned and large enough to pay for it.
        t = HW
    n_hw = HW // t

    if n_hw == 1:
        # Spatial axis fits one tile: grow the block over batch so each DMA is a
        # big contiguous Bb*C*HW slab, but keep >= 2 grid steps for v7x megacore.
        bb_cap = max(1, target_bytes // max(C * t * itemsize, 1))
        if B >= 2:
            bb_cap = min(bb_cap, B // 2)
        Bb = _largest_divisor_leq(B, bb_cap)
    else:
        Bb = 1

    # Degenerate single-step grid (B == 1, one tile): split lanes so both v7x
    # TensorCores get work.
    if B == 1 and n_hw == 1 and lane_aligned and HW // 128 >= 2:
        t = 128 * _largest_divisor_leq(HW // 128, (HW // 128) // 2)
        n_hw = HW // t

    return Bb, t, n_hw


def squash(x, eps=1e-20):
    """x: (B, C, H, W) NCHW. Returns squash(x) with the norm taken over C (dim=1)."""
    B, C, H, W = x.shape
    HW = H * W
    x_flat = x.reshape(B, C, HW)
    itemsize = jnp.dtype(x.dtype).itemsize

    Bb, t, n_hw = _choose_blocking(B, C, HW, itemsize)
    grid = (B // Bb, n_hw)

    out_flat = pl.pallas_call(
        functools.partial(_squash_kernel, eps=eps),
        out_shape=jax.ShapeDtypeStruct((B, C, HW), x.dtype),
        grid_spec=pltpu.PrefetchScalarGridSpec(
            num_scalar_prefetch=0,
            grid=grid,
            in_specs=[pl.BlockSpec((Bb, C, t), lambda b, ti: (b, 0, ti))],
            out_specs=pl.BlockSpec((Bb, C, t), lambda b, ti: (b, 0, ti)),
        ),
        compiler_params=pltpu.CompilerParams(
            dimension_semantics=("parallel", "parallel"),
            vmem_limit_bytes=_VMEM_LIMIT_BYTES),
    )(x_flat)

    return out_flat.reshape(B, C, H, W)


def squash_ref(x, eps=1e-20):
    xf = x.astype(jnp.float32)
    n = jnp.sqrt(jnp.sum(xf * xf, axis=1, keepdims=True))
    return ((n ** 2) / (1.0 + n ** 2) / (n + eps) * xf).astype(x.dtype)


if __name__ == "__main__":
    key = jax.random.PRNGKey(0)
    keys = jax.random.split(key, 5)

    # 1) Small shape matching the module's intended use (NCHW, lane-aligned HW).
    x = jax.random.normal(keys[0], (2, 4, 16, 16), dtype=jnp.float32)
    out = jax.block_until_ready(squash(x))
    ref = squash_ref(x)
    assert out.shape == x.shape and out.dtype == x.dtype
    assert jnp.allclose(out, ref, atol=1e-5, rtol=1e-5), "mismatch (small f32)"

    # 2) Larger spatial extent (HW=2048) — single lane tile, one batch per step.
    x2 = jax.random.normal(keys[1], (2, 8, 32, 64), dtype=jnp.float32)
    out2 = jax.block_until_ready(squash(x2))
    assert jnp.allclose(out2, squash_ref(x2), atol=1e-5, rtol=1e-5), "mismatch (tiled f32)"

    # 3) Non-128-multiple spatial map (6x6) — full-HW block fallback (masked edge).
    x3 = jax.random.normal(keys[2], (2, 8, 6, 6), dtype=jnp.float32)
    out3 = jax.block_until_ready(squash(x3))
    assert jnp.allclose(out3, squash_ref(x3), atol=1e-5, rtol=1e-5), "mismatch (unaligned HW)"

    # 4) Larger batch — exercises batch-folded blocks (Bb > 1).
    x4 = jax.random.normal(keys[3], (8, 4, 16, 16), dtype=jnp.float32)
    out4 = jax.block_until_ready(squash(x4))
    assert jnp.allclose(out4, squash_ref(x4), atol=1e-5, rtol=1e-5), "mismatch (batched blocks)"

    # 5) bf16 I/O (f32 internal math) — halves HBM traffic for bandwidth-bound use.
    x5 = jax.random.normal(keys[4], (2, 16, 32, 32), dtype=jnp.bfloat16)
    out5 = jax.block_until_ready(squash(x5))
    ref5 = squash_ref(x5)
    assert out5.dtype == jnp.bfloat16
    assert jnp.allclose(out5.astype(jnp.float32), ref5.astype(jnp.float32),
                        atol=2e-2, rtol=2e-2), "mismatch (bf16)"

    print("KERNEL_OK")
</pallas_src>

<mosaic_0001>
module attributes {stable_mosaic.version = 11 : i64} {
  func.func @_squash_kernel(%arg0: i32, %arg1: i32, %arg2: memref<1x4x256xf32, #tpu.memory_space<vmem>>, %arg3: memref<1x4x256xf32, #tpu.memory_space<vmem>>) attributes {dimension_semantics = [#tpu.dimension_semantics<parallel>, #tpu.dimension_semantics<parallel>], iteration_bounds = array<i64: 2, 1>, scalar_prefetch = 0 : i64, scratch_operands = 0 : i64, tpu.core_type = #tpu.core_type<tc>, window_params = [{transform_indices = @transform_0, window_bounds = array<i64: 1, 4, 256>}, {transform_indices = @transform_1, window_bounds = array<i64: 1, 4, 256>}]} {
    %c0 = arith.constant 0 : index
    %c0_0 = arith.constant 0 : index
    %c0_1 = arith.constant 0 : index
    %0 = vector.load %arg2[%c0, %c0_0, %c0_1] : memref<1x4x256xf32, #tpu.memory_space<vmem>>, vector<1x4x256xf32>
    %1 = arith.mulf %0, %0 : vector<1x4x256xf32>
    %cst = arith.constant dense<0.000000e+00> : vector<1x256xf32>
    %2 = vector.multi_reduction <add>, %1, %cst [1] : vector<1x4x256xf32> to vector<1x256xf32>
    %3 = vector.shape_cast %2 : vector<1x256xf32> to vector<1x1x256xf32>
    %4 = math.sqrt %3 : vector<1x1x256xf32>
    %cst_2 = arith.constant 1.000000e+00 : f32
    %5 = vector.broadcast %cst_2 : f32 to vector<1x1x256xf32>
    %6 = arith.addf %5, %3 : vector<1x1x256xf32>
    %cst_3 = arith.constant 9.99999968E-21 : f32
    %7 = vector.broadcast %cst_3 : f32 to vector<1x1x256xf32>
    %8 = arith.addf %4, %7 : vector<1x1x256xf32>
    %9 = arith.mulf %6, %8 : vector<1x1x256xf32>
    %10 = tpu.reciprocal %9 : vector<1x1x256xf32> -> vector<1x1x256xf32>
    %11 = arith.mulf %3, %10 : vector<1x1x256xf32>
    %12 = vector.broadcast %11 : vector<1x1x256xf32> to vector<1x4x256xf32>
    %13 = arith.mulf %12, %0 : vector<1x4x256xf32>
    %c0_4 = arith.constant 0 : index
    %c0_5 = arith.constant 0 : index
    %c0_6 = arith.constant 0 : index
    %14 = vector.load %arg3[%c0_4, %c0_5, %c0_6] : memref<1x4x256xf32, #tpu.memory_space<vmem>>, vector<1x4x256xf32>
    tpu.vector_store %arg3[%c0_4, %c0_5, %c0_6], %13 {strides = array<i32>} : memref<1x4x256xf32, #tpu.memory_space<vmem>>, vector<1x4x256xf32>,
    return
  }
  func.func @transform_0(%arg0: i32, %arg1: i32) -> (i32, i32, i32) {
    %c0_i32 = arith.constant 0 : i32
    %c0_i32_0 = arith.constant 0 : i32
    return %arg0, %c0_i32, %arg1 : i32, i32, i32
  }
  func.func @transform_1(%arg0: i32, %arg1: i32) -> (i32, i32, i32) {
    %c0_i32 = arith.constant 0 : i32
    %c0_i32_0 = arith.constant 0 : i32
    return %arg0, %c0_i32, %arg1 : i32, i32, i32
  }
}

</mosaic_0001>

<bundles_post_ra>
// kernel: tpu_custom_call.1
= control target key start
LH: loop header
LB: loop body
LE: loop exit
PB: predicated region body
PF: predicated region fallthrough
CT: control target
= control target key end

     0   :  { %6 = vsyncpa [#allocation3], 0  ;;  %s656_s0 = inlined_call_operand.hbm [shape: f32[2,4,256], index: 0, kind: input, shape index: {}]   ;;  %s657_s1 = inlined_call_operand.hbm [shape: f32[2,4,256], index: 1, kind: output, shape index: {}]  }
   0x1   :  { %8 = vsyncpa [#allocation3 + $0x1], 0 }
   0x2   :  { %9 = vsyncpa [#allocation4], 0 }
   0x3   :  { %11 = vsyncpa [#allocation4 + $0x1], 0  ;;  %s518_s6 = smov 0   ;;  %s520_s7 = smov 0  }
   0x4   :  { %s522_s8 = smov 0   ;;  %s524_s9 = smov 0  }
   0x5   :  { %s526_s10 = smov 0   ;;  %s528_s11 = smov 0  }
   0x6 LB: > { %s308_s12 = sadd.s32 4294967295, %s504_s11   ;;  %s309_s13 = sadd.s32 4294967294, %s504_s11   ;;  %s504_s11 = sphi %s528_s11, %s17_s11   ;;  %s500_s10 = sphi %s526_s10, %s669_s10   ;;  %s496_s9 = sphi %s524_s9, %s668_s9   ;;  %s492_s8 = sphi %s522_s8, %s667_s8   ;;  %s488_s7 = sphi %s520_s7, %s666_s7   ;;  %s484_s6 = sphi %s518_s6, %s665_s6  }
   0x7   : > { %s29_s14 = sadd.s32 1, %s500_s10  ;;  %s38_s15 = sadd.s32 1, %s492_s8 }
   0x8   : > { %p31_p0 = scmp.ge.s32.totalorder %s29_s14, 2  ;;  %p45_p1 = scmp.ne.s32.totalorder %s492_s8, %s488_s7 }
   0x9   : > { %p46_p2 = scmp.eq.s32.totalorder %s504_s11, 0  ;;  %p51_p3 = scmp.ne.s32.totalorder %s488_s7, %s484_s6 }
   0xa   : > { %s671_s14 = smov (%p31_p0, %s29_s14), 0  ;;  %p52_p5 = scmp.eq.s32.totalorder %s308_s12, 0 }
   0xb   : > { %p559_p4 = por %p46_p2, %p45_p1  ;;  %s33_s17 = ssub.s32 %s500_s10, %s671_s14 }
   0xc   : > { %p77_p6 = scmp.eq.s32.totalorder %s308_s12, 1  ;;  %p36_p7 = scmp.eq.s32.totalorder %s33_s17, 0 }
   0xd   : > { %p565_p8 = por %p52_p5, %p51_p3  ;;  %p83_p10 = scmp.eq.s32.totalorder %s309_s13, 1 }
   0xe   : > { %p569_p9 = por %p77_p6, %p45_p1  ;;  %p337_p13 = scmp.lt.s32.totalorder %s504_s11, 2 }
   0xf   : > { %s574_s20 = scalar_select %p36_p7, %s492_s8, %s38_s15  }
  0x10   : > { %p576_p11 = por %p83_p10, %p51_p3  ;;  %s103_s22 = sand.u32 1, %s492_s8  }
  0x11   : > { %s312_s23 = sshll.u32 %s103_s22, 3  ;;  %s323_s24 = sshll.u32 %s500_s10, 7 }
  0x12   : > { %s661_s21 = scalar_select %p576_p11, 1, 0 }
  0x13   : > { %s115_s27 = scalar_lea.hbm %s656_s0, %s323_s24  ;;  %s107_s28 = scalar_lea.vmem [#allocation2], %s312_s23 }
  0x14   : > { %s117_s29 = sshll.u32 %s107_s28, 4  ;;  %p589_p0 = pnand %p337_p13, %p559_p4  ;;  %s118_s29 = int_to_ptr.vmem [resolvable:$true] %s117_s29 }
  0x15   : > { %p315_p1 = scmp.ge.s32.totalorder %s504_s11, 1  ;;  %p122_p2 = scmp.lt.s32.totalorder %s504_s11, 3 }
  0x16   : > { %s104_s2 = scalar_lea.sflag [#allocation3], %s103_s22  ;;  %p398_p3 = pneg %p589_p0 }
  0x17   : > { %s409_s3 = scalar_lea.vmem %s118_s29, 128  ;;  %s506_s4 = smov [#allocation2]  }
  0x18   : > { %p410_p5 = scmp.ne.s32.totalorder %s118_s29, %s409_s3  ;;  %s414_s5 = sshll.u32 %s506_s4, 4  ;;  %s415_s5 = int_to_ptr.vmem [resolvable:$false] %s414_s5 }
  0x19   : > { %s416_s12 = scalar_lea.vmem %s415_s5, 256  ;;  %p417_p10 = scmp.lt.s32.totalorder %s118_s29, %s415_s5 }
  0x1a   : > { %p412_p6 = pnand %p410_p5, %p398_p3  ;;  %p418_p12 = scmp.lt.s32.totalorder %s416_s12, %s409_s3 }
  0x1c   : > { %p413_p7 = pneg %p412_p6  ;;  %p419_p4 = por %p418_p12, %p417_p10 }
  0x1e   : > { %p420_p13 = pnand %p419_p4, %p413_p7 }
  0x20   : > { %423 = shalt.err (!%p420_p13)
}
  0x21   : > { %332 = dma.hbm_to_vmem [thread:$0]  (!%p589_p0), %s115_s27, 128, %s118_s29, %s104_s2  }
  0x22   : > { %p123_p11 = pnand %p315_p1, %p122_p2 }
  0x23   : > { %s604_s13 = sand.u32 (!%p123_p11), 1, %s488_s7  }
  0x24   : > { %126 = sbr.rel (%p123_p11) target bundleno = 115 (0x73), region = 24  ;;  %s316_s15 = sshll.u32 (!%p123_p11), %s604_s13, 3 }
  0x25   : > { %s129_s16 = scalar_lea.sflag (!%p123_p11), [#allocation3], %s604_s13  ;;  %s132_s17 = scalar_lea.vmem (!%p123_p11), [#allocation2], %s316_s15 }
  0x29   : > { %475 = dma.done.wait (%p565_p8), %s129_s16, 128  }
  0x2a   : > { %477 = vsyncadd (%p565_p8), %s129_s16, 4294967168  ;;  %v153_v0 = vld [vmem:[%s132_s17] sm:$0xff]  ;;  %vm158_vm0 = vcmask 1043456   ;;  %s150_s18 = scalar_lea.vmem [#allocation5], %s316_s15  ;;  %s324_s23 = sshll.u32 %s496_s9, 7 }
  0x2b   : > { %v154_v1 = vmul.f32 %v153_v0, %v153_v0  ;;  %v198_v35 = vcombine.high %v153_v0, %v153_v0  ;;  %s224_s22 = sshll.u32 %s150_s18, 4  ;;  %s222_s26 = scalar_lea.hbm %s657_s1, %s324_s23  ;;  %s225_s22 = int_to_ptr.vmem [resolvable:$true] %s224_s22 }
  0x2c   : > { %s208_s27 = scalar_lea.sflag [#allocation4], %s604_s13  ;;  %s424_s28 = scalar_lea.vmem %s225_s22, 128 }
  0x2d   : > { %v156_v2 = vcombine.high %v154_v1, %v154_v1  ;;  %v159_v3 = vsel %vm158_vm0, %v154_v1, 0.0  ;;  %p425_p8 = scmp.ne.s32.totalorder %s225_s22, %s424_s28  ;;  %s507_s29 = smov [#allocation5]  }
  0x2e   : > { %v160_v4 = vrot.slane %v159_v3, 4  ;;  %s428_s30 = sshll.u32 %s507_s29, 4  ;;  %s429_s30 = int_to_ptr.vmem [resolvable:$false] %s428_s30 }
  0x2f   : > { %v166_v5 = vsel %vm158_vm0, %v156_v2, 0.0  ;;  %p426_p11 = pnand %p425_p8, %p569_p9  ;;  %s430_s2 = scalar_lea.vmem %s429_s30, 256 }
  0x30   : > { %v161_v6 = vadd.f32 %v160_v4, %v159_v3  ;;  %v167_v7 = vrot.slane %v166_v5, 4  ;;  %p431_p0 = scmp.lt.s32.totalorder %s225_s22, %s429_s30  ;;  %p432_p1 = scmp.lt.s32.totalorder %s430_s2, %s424_s28 }
  0x31   : > { %p427_p12 = pneg %p426_p11 }
  0x32   : > { %v162_v8 = vrot.slane %v161_v6, 2  ;;  %v168_v9 = vadd.f32 %v167_v7, %v166_v5  ;;  %p433_p2 = por %p432_p1, %p431_p0 }
  0x34   : > { %v163_v10 = vadd.f32 %v162_v8, %v161_v6  ;;  %v169_v11 = vrot.slane %v168_v9, 2  ;;  %p434_p3 = pnand %p433_p2, %p427_p12 }
  0x36   : > { %v164_v12 = vrot.slane %v163_v10, 1  ;;  %v170_v13 = vadd.f32 %v169_v11, %v168_v9 }
  0x38   : > { %v165_v14 = vadd.f32 %v164_v12, %v163_v10  ;;  %v171_v15 = vrot.slane %v170_v13, 1 }
  0x3a   : > { %v172_v16 = vadd.f32 %v171_v15, %v170_v13  ;;  %388 = vrsqrt.f32 %v165_v14  ;;  %vm175_vm1 = vcmp.eq.f32.partialorder %v165_v14, inf  ;;  %v178_v18 = vand.u32 2147483648, %v165_v14 }
  0x3b   : > { %vm177_vm2 = vcmp.eq.f32.partialorder %v165_v14, 0.0  ;;  %v187_v24 = vadd.f32 1.0, %v165_v14 }
  0x3c   : > { %390 = vrsqrt.f32 %v172_v16  ;;  %vm182_vm3 = vcmp.eq.f32.partialorder %v172_v16, inf  ;;  %v185_v21 = vand.u32 2147483648, %v172_v16  ;;  %vm184_vm4 = vcmp.eq.f32.partialorder %v172_v16, 0.0 }
  0x3d   : > { %v188_v27 = vadd.f32 1.0, %v172_v16 }
  0x47   : > { %v389_v17 = vpop.eup %388 }
  0x48   : > { %v174_v19 = vmul.f32 %v389_v17, %v165_v14 }
  0x49   : > { %v391_v20 = vpop.eup %390 }
  0x4a   : > { %v176_v22 = vsel %vm175_vm1, %v165_v14, %v174_v19  ;;  %v181_v23 = vmul.f32 %v391_v20, %v172_v16 }
  0x4b   : > { %v179_v25 = vsel %vm177_vm2, %v178_v18, %v176_v22 }
  0x4c   : > { %v183_v26 = vsel %vm182_vm3, %v172_v16, %v181_v23  ;;  %v189_v28 = vadd.f32 1e-20, %v179_v25 }
  0x4d   : > { %v186_v29 = vsel %vm184_vm4, %v185_v21, %v183_v26 }
  0x4e   : > { %v190_v30 = vadd.f32 1e-20, %v186_v29  ;;  %v191_v31 = vmul.f32 %v189_v28, %v187_v24 }
  0x50   : > { %v192_v32 = vmul.f32 %v190_v30, %v188_v27  ;;  %392 = vrcp.f32 %v191_v31 }
  0x52   : > { %394 = vrcp.f32 %v192_v32 }
  0x5d   : > { %v393_v33 = vpop.eup %392 }
  0x5e   : > { %v195_v34 = vmul.f32 %v393_v33, %v165_v14 }
  0x5f   : > { %v395_v36 = vpop.eup %394 }
  0x60   : > { %v196_v37 = vmul.f32 %v395_v36, %v172_v16  ;;  %v200_v38 = vmul.f32 %v195_v34, %v153_v0 }
  0x62   : > { %v201_v39 = vmul.f32 %v198_v35, %v196_v37 }
  0x64   : > { %v204_v40 = vcombine.low %v200_v38, %v201_v39 }
  0x66   : > { %206 = vst [vmem:[%s150_s18] sm:$0xff] %v204_v40 }
  0x67   : > { %437 = shalt.err (!%p434_p3)
}
  0x68   : > { %s438_s9 = scalar_lea.hbm %s222_s26, 128  ;;  %s442_s5 = scalar_lea.hbm %s657_s1, 256 }
  0x69   : > { %p439_p5 = scmp.ne.s32.totalorder %s222_s26, %s438_s9  ;;  %p443_p10 = scmp.lt.s32.totalorder %s222_s26, %s657_s1 }
  0x6a   : > { %p444_p4 = scmp.lt.s32.totalorder %s442_s5, %s438_s9 }
  0x6b   : > { %p440_p6 = pnand %p439_p5, %p569_p9 }
  0x6c   : > { %p445_p13 = por %p444_p4, %p443_p10 }
  0x6d   : > { %p441_p7 = pneg %p440_p6 }
  0x6f   : > { %p446_p8 = pnand %p445_p13, %p441_p7 }
  0x71   : > { %449 = shalt.err (!%p446_p8)
}
  0x72   : > { %327 = dma.vmem_to_hbm [thread:$0]  (%p569_p9), %s225_s22, 128, %s222_s26, %s208_s27  }
  0x73 PF: > { %s236_s15 = sand.u32 1, %s484_s6   ;;  %p663_p11 = scmp.ne.s32.totalorder %s661_s21, 0 }
  0x74   : > { %p664_p12 = scmp.ge.s32.totalorder %s504_s11, 2  ;;  %s237_s16 = scalar_lea.sflag [#allocation4], %s236_s15 }
  0x76   : > { %p334_p0 = pnand %p664_p12, %p663_p11 }
  0x78   : > { %p335_p1 = pneg %p334_p0 }
  0x7a   : > { %479 = dma.done.wait (%p335_p1), %s237_s16, 128  }
  0x7b   : > { %481 = vsyncadd (%p335_p1), %s237_s16, 4294967168  ;;  %s17_s11 = sadd.s32 1, %s504_s11   ;;  %s665_s6 = smov %s488_s7 }
  0x7c   : > { %p14_p2 = scmp.ge.s32.totalorder %s17_s11, 4   ;;  %s666_s7 = smov %s492_s8 }
  0x7d   : > { %s667_s8 = smov %s574_s20  ;;  %s668_s9 = smov %s500_s10 }
  0x7e   : > { %s669_s10 = smov %s671_s14  ;;  %16 = sbr.rel (!%p14_p2) target bundleno = 6 (0x6), region = 69 }
  0x83   :  { %242 = vsyncpa [#allocation3], 1 }
  0x84   :  { %244 = vsyncpa [#allocation3 + $0x1], 1 }
  0x85   :  { %245 = vsyncpa [#allocation4], 1 }
  0x86   :  { %247 = vsyncpa [#allocation4 + $0x1], 1 }

</bundles_post_ra>
